<compile_context>
chip_gen: v7x
topology: tpu7x:2x2x1
jax: 0.10.0
libtpu: 0.0.40
codegen_flags: <defaults>
</compile_context>

<pallas_src>
import math

import jax
import jax.numpy as jnp
from jax import lax
from jax.experimental import pallas as pl
from jax.experimental.pallas import tpu as pltpu

_INV_SQRT2 = 1.0 / math.sqrt(2.0)


def _mlp_kernel(x_ref, w1_ref, b1_ref, w2_ref, b2_ref, o_ref):
    # fc1: native-dtype operands into the MXU, f32 accumulation.
    h = jnp.dot(x_ref[...], w1_ref[...], preferred_element_type=jnp.float32)
    h = h + b1_ref[...].astype(jnp.float32)

    # Exact GELU (matches torch.nn.GELU default): 0.5*x*(1 + erf(x/sqrt(2))).
    h = 0.5 * h * (1.0 + lax.erf(h * _INV_SQRT2))

    # fc2: cast activation back to the weight dtype so bf16 weights take the
    # native MXU path (no-op for f32 weights), f32 accumulation.
    y = jnp.dot(h.astype(w2_ref.dtype), w2_ref[...],
                preferred_element_type=jnp.float32)
    y = y + b2_ref[...].astype(jnp.float32)

    o_ref[...] = y.astype(o_ref.dtype)


def _round_up(x, m):
    return ((x + m - 1) // m) * m


def mlp_forward(x, w1, b1, w2, b2, *, tm_max=512):
    """x: (..., in_dim) -> (..., in_dim). w1: (in, hid), w2: (hid, in)."""
    orig_shape = x.shape
    in_dim = orig_shape[-1]
    hidden = w1.shape[1]

    x2d = x.reshape(-1, in_dim)
    M = x2d.shape[0]

    # Row tile: as large as practical for MXU utilization, multiple of the
    # sublane packing (8 for f32, 16 for bf16), never larger than padded M.
    row_align = 16 if x.dtype == jnp.bfloat16 else 8
    tm = min(tm_max, _round_up(M, row_align))
    tm = _round_up(tm, row_align)

    # Pad rows so the grid covers M with full tiles (padded rows sliced off).
    m_pad = _round_up(M, tm)
    if m_pad != M:
        x2d = jnp.pad(x2d, ((0, m_pad - M), (0, 0)))

    b1_2d = b1.reshape(1, hidden)
    b2_2d = b2.reshape(1, in_dim)

    # VMEM budget: single-buffered weights/biases + double-buffered x/out tiles
    # + f32 intermediates, with 2x headroom (capped below physical VMEM).
    wb = jnp.dtype(w1.dtype).itemsize
    xb = jnp.dtype(x.dtype).itemsize
    est = ((in_dim * hidden + hidden * in_dim + hidden + in_dim) * wb
           + 2 * 2 * tm * in_dim * xb
           + tm * hidden * 4 + tm * in_dim * 4)
    vmem_limit = int(min(96 * 1024 * 1024, max(32 * 1024 * 1024, 2 * est)))

    # TODO(synk): if in_dim*hidden weights exceed ~40 MiB (v7x 64 MiB VMEM),
    # tile the hidden dim (and K-reduce fc2 with an f32 accumulator) instead of
    # keeping both weights fully resident.
    def resident(shape):
        # Constant index map -> weight stays in VMEM across the whole grid;
        # a single buffer is enough (no prefetch needed).
        return pl.BlockSpec(shape, lambda i: (0, 0),
                            pipeline_mode=pl.Buffered(1))

    out = pl.pallas_call(
        _mlp_kernel,
        out_shape=jax.ShapeDtypeStruct((m_pad, in_dim), x.dtype),
        grid_spec=pltpu.PrefetchScalarGridSpec(
            num_scalar_prefetch=0,
            grid=(m_pad // tm,),
            in_specs=[
                pl.BlockSpec((tm, in_dim), lambda i: (i, 0)),  # x tile (streamed)
                resident((in_dim, hidden)),                    # W1 (resident)
                resident((1, hidden)),                         # b1
                resident((hidden, in_dim)),                    # W2 (resident)
                resident((1, in_dim)),                         # b2
            ],
            out_specs=pl.BlockSpec((tm, in_dim), lambda i: (i, 0)),
        ),
        compiler_params=pltpu.CompilerParams(
            dimension_semantics=("parallel",),   # shard row tiles across TCs
            vmem_limit_bytes=vmem_limit,
        ),
    )(x2d, w1, b1_2d, w2, b2_2d)

    return out[:M].reshape(orig_shape)


def _init_params(key, in_dim, hidden_dim, dtype=jnp.float32):
    # Deterministic init mimicking nn.Linear defaults (uniform +-1/sqrt(fan_in)).
    k1, k2, k3, k4 = jax.random.split(key, 4)
    lim1 = 1.0 / math.sqrt(in_dim)
    lim2 = 1.0 / math.sqrt(hidden_dim)
    w1 = jax.random.uniform(k1, (in_dim, hidden_dim), dtype, -lim1, lim1)
    b1 = jax.random.uniform(k2, (hidden_dim,), dtype, -lim1, lim1)
    w2 = jax.random.uniform(k3, (hidden_dim, in_dim), dtype, -lim2, lim2)
    b2 = jax.random.uniform(k4, (in_dim,), dtype, -lim2, lim2)
    return w1, b1, w2, b2


def _ref_mlp(x, w1, b1, w2, b2):
    h = x @ w1 + b1
    h = 0.5 * h * (1.0 + lax.erf(h / math.sqrt(2.0)))
    return h @ w2 + b2


if __name__ == "__main__":
    key = jax.random.PRNGKey(0)
    batch, seq, in_dim, hidden_dim = 2, 8, 32, 64

    kx, kp = jax.random.split(key)
    x = jax.random.normal(kx, (batch, seq, in_dim), dtype=jnp.float32)
    w1, b1, w2, b2 = _init_params(kp, in_dim, hidden_dim)

    out = mlp_forward(x, w1, b1, w2, b2)
    out = jax.block_until_ready(out)

    ref = _ref_mlp(x, w1, b1, w2, b2)
    assert out.shape == x.shape
    assert jnp.allclose(out, ref, atol=1e-5, rtol=1e-5)

    # Exercise the padded-tail path (row count not a multiple of the tile).
    x2 = jax.random.normal(jax.random.PRNGKey(1), (3, 7, in_dim),
                           dtype=jnp.float32)
    out2 = jax.block_until_ready(mlp_forward(x2, w1, b1, w2, b2))
    assert jnp.allclose(out2, _ref_mlp(x2, w1, b1, w2, b2),
                        atol=1e-5, rtol=1e-5)

    print("KERNEL_OK")
</pallas_src>

<mosaic_0001>
module attributes {stable_mosaic.version = 11 : i64} {
  func.func @_mlp_kernel(%arg0: i32, %arg1: memref<16x32xf32, #tpu.memory_space<vmem>>, %arg2: memref<32x64xf32, #tpu.memory_space<vmem>>, %arg3: memref<1x64xf32, #tpu.memory_space<vmem>>, %arg4: memref<64x32xf32, #tpu.memory_space<vmem>>, %arg5: memref<1x32xf32, #tpu.memory_space<vmem>>, %arg6: memref<16x32xf32, #tpu.memory_space<vmem>>) attributes {dimension_semantics = [#tpu.dimension_semantics<parallel>], iteration_bounds = array<i64: 1>, scalar_prefetch = 0 : i64, scratch_operands = 0 : i64, tpu.core_type = #tpu.core_type<tc>, window_params = [{transform_indices = @transform_0, window_bounds = array<i64: 16, 32>}, {pipeline_mode = #tpu.pipeline_mode<synchronous>, transform_indices = @transform_1, window_bounds = array<i64: 32, 64>}, {pipeline_mode = #tpu.pipeline_mode<synchronous>, transform_indices = @transform_2, window_bounds = array<i64: 1, 64>}, {pipeline_mode = #tpu.pipeline_mode<synchronous>, transform_indices = @transform_3, window_bounds = array<i64: 64, 32>}, {pipeline_mode = #tpu.pipeline_mode<synchronous>, transform_indices = @transform_4, window_bounds = array<i64: 1, 32>}, {transform_indices = @transform_5, window_bounds = array<i64: 16, 32>}]} {
    %c0 = arith.constant 0 : index
    %c0_0 = arith.constant 0 : index
    %0 = vector.load %arg1[%c0, %c0_0] : memref<16x32xf32, #tpu.memory_space<vmem>>, vector<16x32xf32>
    %c0_1 = arith.constant 0 : index
    %c0_2 = arith.constant 0 : index
    %1 = vector.load %arg2[%c0_1, %c0_2] : memref<32x64xf32, #tpu.memory_space<vmem>>, vector<32x64xf32>
    %cst = arith.constant dense<0.000000e+00> : vector<16x64xf32>
    %2 = tpu.matmul %0, %1, %cst {dimension_numbers = #tpu.dot_dimension_numbers<[1], [0], [0], [1], [0, 0, 1, 1], [], []>} : vector<16x32xf32>, vector<32x64xf32>, vector<16x64xf32> -> vector<16x64xf32>
    %c0_3 = arith.constant 0 : index
    %c0_4 = arith.constant 0 : index
    %3 = vector.load %arg3[%c0_3, %c0_4] : memref<1x64xf32, #tpu.memory_space<vmem>>, vector<1x64xf32>
    %4 = vector.broadcast %3 : vector<1x64xf32> to vector<16x64xf32>
    %5 = arith.addf %2, %4 : vector<16x64xf32>
    %cst_5 = arith.constant 5.000000e-01 : f32
    %6 = vector.broadcast %cst_5 : f32 to vector<16x64xf32>
    %7 = arith.mulf %6, %5 : vector<16x64xf32>
    %cst_6 = arith.constant 0.707106769 : f32
    %8 = vector.broadcast %cst_6 : f32 to vector<16x64xf32>
    %9 = arith.mulf %5, %8 : vector<16x64xf32>
    %10 = math.erf %9 : vector<16x64xf32>
    %cst_7 = arith.constant 1.000000e+00 : f32
    %11 = vector.broadcast %cst_7 : f32 to vector<16x64xf32>
    %12 = arith.addf %11, %10 : vector<16x64xf32>
    %13 = arith.mulf %7, %12 : vector<16x64xf32>
    %c0_8 = arith.constant 0 : index
    %c0_9 = arith.constant 0 : index
    %14 = vector.load %arg4[%c0_8, %c0_9] : memref<64x32xf32, #tpu.memory_space<vmem>>, vector<64x32xf32>
    %cst_10 = arith.constant dense<0.000000e+00> : vector<16x32xf32>
    %15 = tpu.matmul %13, %14, %cst_10 {dimension_numbers = #tpu.dot_dimension_numbers<[1], [0], [0], [1], [0, 0, 1, 1], [], []>} : vector<16x64xf32>, vector<64x32xf32>, vector<16x32xf32> -> vector<16x32xf32>
    %c0_11 = arith.constant 0 : index
    %c0_12 = arith.constant 0 : index
    %16 = vector.load %arg5[%c0_11, %c0_12] : memref<1x32xf32, #tpu.memory_space<vmem>>, vector<1x32xf32>
    %17 = vector.broadcast %16 : vector<1x32xf32> to vector<16x32xf32>
    %18 = arith.addf %15, %17 : vector<16x32xf32>
    %c0_13 = arith.constant 0 : index
    %c0_14 = arith.constant 0 : index
    %19 = vector.load %arg6[%c0_13, %c0_14] : memref<16x32xf32, #tpu.memory_space<vmem>>, vector<16x32xf32>
    tpu.vector_store %arg6[%c0_13, %c0_14], %18 {strides = array<i32>} : memref<16x32xf32, #tpu.memory_space<vmem>>, vector<16x32xf32>,
    return
  }
  func.func @transform_0(%arg0: i32) -> (i32, i32) {
    %c0_i32 = arith.constant 0 : i32
    %c0_i32_0 = arith.constant 0 : i32
    return %arg0, %c0_i32 : i32, i32
  }
  func.func @transform_1(%arg0: i32) -> (i32, i32) {
    %c0_i32 = arith.constant 0 : i32
    %c0_i32_0 = arith.constant 0 : i32
    %c0_i32_1 = arith.constant 0 : i32
    return %c0_i32, %c0_i32_0 : i32, i32
  }
  func.func @transform_2(%arg0: i32) -> (i32, i32) {
    %c0_i32 = arith.constant 0 : i32
    %c0_i32_0 = arith.constant 0 : i32
    %c0_i32_1 = arith.constant 0 : i32
    return %c0_i32, %c0_i32_0 : i32, i32
  }
  func.func @transform_3(%arg0: i32) -> (i32, i32) {
    %c0_i32 = arith.constant 0 : i32
    %c0_i32_0 = arith.constant 0 : i32
    %c0_i32_1 = arith.constant 0 : i32
    return %c0_i32, %c0_i32_0 : i32, i32
  }
  func.func @transform_4(%arg0: i32) -> (i32, i32) {
    %c0_i32 = arith.constant 0 : i32
    %c0_i32_0 = arith.constant 0 : i32
    %c0_i32_1 = arith.constant 0 : i32
    return %c0_i32, %c0_i32_0 : i32, i32
  }
  func.func @transform_5(%arg0: i32) -> (i32, i32) {
    %c0_i32 = arith.constant 0 : i32
    %c0_i32_0 = arith.constant 0 : i32
    return %arg0, %c0_i32 : i32, i32
  }
}

</mosaic_0001>

<bundles_post_ra>
// kernel: tpu_custom_call.1
= control target key start
LH: loop header
LB: loop body
LE: loop exit
PB: predicated region body
PF: predicated region fallthrough
CT: control target
= control target key end

     0   :  { %vm34_vm0 = vcmask 261120   ;;  %s445_s0 = inlined_call_operand.vmem [shape: f32[16,32], index: 0, kind: input, shape index: {}]   ;;  %s446_s1 = inlined_call_operand.vmem [shape: f32[32,64], index: 1, kind: input, shape index: {}]   ;;  %s447_s2 = inlined_call_operand.vmem [shape: f32[1,64], index: 2, kind: input, shape index: {}]   ;;  %s448_s3 = inlined_call_operand.vmem [shape: f32[64,32], index: 3, kind: input, shape index: {}]   ;;  %s449_s4 = inlined_call_operand.vmem [shape: f32[1,32], index: 4, kind: input, shape index: {}]   ;;  %s450_s5 = inlined_call_operand.hbm [shape: f32[16,32], index: 5, kind: output, shape index: {}]  }
   0x1   :  { %v23_v0 = vld [vmem:[%s446_s1] sm:$0xff]  ;;  %v24_v1 = vld [vmem:[%s446_s1 + $0x8] sm:$0xff]  ;;  %v25_v2 = vld [vmem:[%s446_s1 + $0x10] sm:$0xff] }
   0x2   :  { %v293_v3 = vpack.c.bf16 %v24_v1, %v23_v0  ;;  %v26_v4 = vld [vmem:[%s446_s1 + $0x18] sm:$0xff]  ;;  %v21_v5 = vld [vmem:[%s445_s0] sm:$0xff] }
   0x3   :  { %v297_v6 = vpack.c.bf16 %v26_v4, %v25_v2  ;;  %271 = vmatprep.mubr.msk.f32.mxu0 %vm34_vm0, %v21_v5 }
   0x4   :  { %10 = vsyncpa [#allocation3], 0  ;;  %294 = vmatprep.subr.bf16.mxu0 %v293_v3  ;;  %v22_v7 = vld [vmem:[%s445_s0 + $0x8] sm:$0xff]  ;;  %v126_v8 = vld [vmem:[%s448_s3] sm:$0xff]  ;;  %vm141_vm1 = vcmask 523264   ;;  %s348_s21 = smov [#allocation2]  }
   0x5   :  { %296 = vmatpush3.bf16.msra.mxu0 %v293_v3  ;;  %v127_v9 = vld [vmem:[%s448_s3 + $0x8] sm:$0xff]  ;;  %v128_v11 = vld [vmem:[%s448_s3 + $0x10] sm:$0xff]  ;;  %v129_v12 = vld [vmem:[%s448_s3 + $0x18] sm:$0xff]  ;;  %s230_s22 = sshll.u32 %s348_s21, 4  ;;  %s231_s22 = int_to_ptr.vmem [resolvable:$true] %s230_s22 }
   0x6   :  { %298 = vmatprep.subr.bf16.mxu0 %v297_v6  ;;  %v301_v10 = vpack.c.bf16 %v127_v9, %v126_v8  ;;  %v305_v13 = vpack.c.bf16 %v129_v12, %v128_v11  ;;  %v130_v14 = vld [vmem:[%s448_s3 + $0x20] sm:$0xff]  ;;  %v131_v15 = vld [vmem:[%s448_s3 + $0x28] sm:$0xff]  ;;  %v132_v17 = vld [vmem:[%s448_s3 + $0x30] sm:$0xff]  ;;  %s324_s23 = scalar_lea.vmem %s231_s22, 256  ;;  %p329_p1 = scmp.lt.s32.totalorder %s231_s22, %s231_s22 }
   0x7   :  { %v309_v16 = vpack.c.bf16 %v131_v15, %v130_v14  ;;  %v133_v18 = vld [vmem:[%s448_s3 + $0x38] sm:$0xff]  ;;  %v241_v20 = vld [vmem:[%s447_s2] ss:$0 sm:$0xff]  ;;  %p325_p0 = scmp.ne.s32.totalorder %s231_s22, %s324_s23  ;;  %p330_p2 = scmp.lt.s32.totalorder %s324_s23, %s324_s23 }
   0x8   :  { %302 = vmatprep.subr.bf16.mxu1 %v301_v10  ;;  %v313_v19 = vpack.c.bf16 %v133_v18, %v132_v17  ;;  %v244_v35 = vld [vmem:[%s449_s4] ss:$0 sm:$0xff] }
   0x9   :  { %300 = vmatpush3.bf16.msra.mxu0 %v297_v6  ;;  %304 = vmatpush3.bf16.msra.mxu1 %v301_v10  ;;  %p331_p3 = por %p330_p2, %p329_p1 }
   0xa   :  { %306 = vmatprep.subr.bf16.mxu1 %v305_v13 }
   0xb   :  { %p332_p4 = pnand %p331_p3, %p325_p0 }
   0xc   :  { %272 = vmatmul.mubr.msk.f32.vlgmr.msra.gmra.mrb[0].mxu0 %vm34_vm0, %v22_v7 }
   0xd   :  { %308 = vmatpush3.bf16.msra.mxu1 %v305_v13 }
   0xe   :  { %310 = vmatprep.subr.bf16.mxu1 %v309_v16 }
  0x11   :  { %312 = vmatpush3.bf16.msra.mxu1 %v309_v16 }
  0x12   :  { %314 = vmatprep.subr.bf16.mxu1 %v313_v19 }
  0x15   :  { %316 = vmatpush3.bf16.msra.mxu1 %v313_v19 }
  0xdf   :  { %v273_v21 = vpop.f32.mrb[0].mxu0 }
  0xe0   :  { %v113_v22 = vadd.f32 %v273_v21, %v241_v20  ;;  %v107_v23 = vpop.f32.mrb[1].mxu0 }
  0xe1   :  { %v108_v24 = vadd.f32 %v241_v20, %v107_v23 }
  0xe2   :  { %v119_v25 = vmul.f32 0.70710677, %v113_v22  ;;  %v117_v32 = vmul.f32 0.5, %v113_v22 }
  0xe3   :  { %v118_v26 = vmul.f32 0.70710677, %v108_v24  ;;  %v116_v30 = vmul.f32 0.5, %v108_v24 }
  0xe4   :  { %320 = verf.f32 %v119_v25 }
  0xe5   :  { %322 = verf.f32 %v118_v26 }
  0xee   :  { %v321_v27 = vpop.eup %320 }
  0xef   :  { %v323_v28 = vpop.eup %322  ;;  %v123_v29 = vadd.f32 1.0, %v321_v27 }
  0xf0   :  { %v122_v31 = vadd.f32 1.0, %v323_v28 }
  0xf1   :  { %v125_v34 = vmul.f32 %v123_v29, %v117_v32 }
  0xf2   :  { %v124_v33 = vmul.f32 %v122_v31, %v116_v30 }
  0xf4   :  { %290 = vmatprep.mubr.msk.f32.mxu1 %vm141_vm1, %v124_v33 }
  0xf5   :  { %291 = vmatmul.mubr.msk.f32.vlgmr.msra.gmra.mrb[0].mxu1 %vm141_vm1, %v125_v34 }
 0x1c8   :  { %v292_v36 = vpop.f32.mrb[0].mxu1 }
 0x1c9   :  { %v220_v37 = vadd.f32 %v292_v36, %v244_v35  ;;  %v214_v38 = vpop.f32.mrb[1].mxu1 }
 0x1ca   :  { %v215_v39 = vadd.f32 %v244_v35, %v214_v38 }
 0x1cb   :  { %224 = vst.msk [vmem:[#allocation2 + $0x8] sm:$0xff] %vm34_vm0, %v220_v37 }
 0x1cc   :  { %223 = vst.msk [vmem:[#allocation2] sm:$0xff] %vm34_vm0, %v215_v39 }
 0x1cd   :  { %335 = shalt.err (!%p332_p4)
}
 0x1ce   :  { %s336_s25 = scalar_lea.hbm %s450_s5, 256 }
 0x1cf   :  { %p337_p5 = scmp.ne.s32.totalorder %s450_s5, %s336_s25  ;;  %p340_p6 = scmp.lt.u32.totalorder %s336_s25, %s450_s5 }
 0x1d1   :  { %p342_p7 = pnand %p340_p6, %p337_p5 }
 0x1d3   :  { %345 = shalt.err (!%p342_p7)
}
 0x1d4   :  { %s349_s30 = smov 128   ;;  %s350_s1 = smov 8  }
 0x1d5   :  { %236 = dma.vmem_to_hbm [thread:$0]  %s231_s22, 256, %s450_s5, [#allocation3], %s349_s30, %s349_s30, %s350_s1  }
 0x1d6   :  { %346 = dma.done.wait [#allocation3], 256  }
 0x1d7   :  { %347 = vsyncadd [#allocation3], 4294967040 }
 0x1d8   :  { %240 = vsyncpa [#allocation3], 1 }

</bundles_post_ra>
